<compile_context>
chip_gen: v5e
topology: v5e:2x2
jax: 0.10.0
libtpu: 0.0.40
codegen_flags: <defaults>
</compile_context>

<pallas_src>
import functools

import jax
import jax.numpy as jnp
from jax import lax
from jax.experimental import pallas as pl
from jax.experimental.pallas import tpu as pltpu


_F32_EXP_BIAS = 127
_F32_MANT_SHIFT = 23


# ----------------------------- BFP quantization ------------------------------
def _bfp_quantize(x, mant_bits: int, block_size: int, *, scale=1.0,
                  bitcast=lax.bitcast_convert_type):
    """Block-floating-point quantization along the last dim (static config).

    Shared exponent per block of `block_size` elements, `mant_bits` signed
    mantissa bits, round-to-nearest.  The shared exponent is obtained by
    exponent-field extraction (pure VPU integer work) rather than log2/exp2/div,
    and `scale` (Python float or traced scalar) is folded into the dequant step.
    """
    n = x.shape[-1]
    assert n % block_size == 0, "block_size must divide the last dim"
    nb = n // block_size
    if nb == 1:
        xb = x  # whole last dim is one block; avoid in-kernel reshape
    else:
        # TODO(synk): for block_size < 128 this reshape puts a sub-lane-width dim
        # in the lane position (masked vregs / relayouts); a lane-dense segmented
        # max would be preferable there.  block_size multiples of 128 stay
        # lane-dense and are cheap.
        xb = x.reshape(x.shape[:-1] + (nb, block_size))

    # Per-block max(|x|) without a per-element abs: both reductions run on the
    # XLU (slack slot); only the per-block negate/maximum stays on the VPU.
    max_abs = jnp.maximum(jnp.max(xb, axis=-1, keepdims=True),
                          -jnp.min(xb, axis=-1, keepdims=True))

    # floor(log2(max_abs)) via the f32 exponent field (max_abs >= 0).
    bits = bitcast(max_abs, jnp.int32)
    bexp = (bits >> _F32_MANT_SHIFT) & 0xFF                       # biased exponent
    # step = 2^(exp - (mant_bits-1)); build its (clamped) biased exponent and
    # that of 1/step directly, so quantization uses a multiply, not a divide.
    step_bexp = jnp.clip(bexp - (mant_bits - 1), 1, 254)
    inv_bexp = jnp.clip(254 - step_bexp, 1, 254)
    step = bitcast(step_bexp << _F32_MANT_SHIFT, jnp.float32)      # (..., nb, 1)
    step_inv = bitcast(inv_bexp << _F32_MANT_SHIFT, jnp.float32)   # (..., nb, 1)

    qmax = float(2 ** (mant_bits - 1) - 1)
    qv = jnp.clip(jnp.round(xb * step_inv), -qmax - 1.0, qmax)
    y = qv * (step * scale)   # per-block dequant step, output scale folded in
    if nb != 1:
        y = y.reshape(x.shape)
    return y


# --------------------------------- kernel ------------------------------------
def _qkt_bfp_kernel(scale_ref, q_ref, k_ref, o_ref, *, mant_bits, block_size):
    # scale_ref: (1,) f32 in SMEM; q_ref: (TM, D); k_ref: (S, D); o_ref: (TM, S).
    # q @ k^T expressed as a direct contraction over D — no in-kernel transpose.
    s = lax.dot_general(
        q_ref[...], k_ref[...],
        dimension_numbers=(((1,), (1,)), ((), ())),
        preferred_element_type=jnp.float32,
    )  # (TM, S) f32 (MXU accumulates f32 for both f32 and bf16 operands)
    o_ref[...] = _bfp_quantize(
        s, mant_bits, block_size, scale=scale_ref[0], bitcast=pltpu.bitcast
    ).astype(o_ref.dtype)


# ------------------------- generation-aware sizing ----------------------------
def _vmem_budget_bytes():
    """Target VMEM budget for kernel tiles, derived from the chip generation."""
    cap = None
    try:
        cap = int(pltpu.get_tpu_info().vmem_capacity_bytes)
    except Exception:  # conservative fallback (off-TPU tracing / API drift)
        cap = None
    if cap is None:
        cap = 64 << 20
    if cap <= (80 << 20):        # v7x-class (64 MiB physical): leave headroom
        return 48 << 20, cap
    return 96 << 20, cap         # v5e / v6e (128 MiB physical): use much more of it


def _choose_tm(tm, S, D, in_bytes, out_bytes, budget, k_buffers):
    """Pick the query-dim tile.  Tiled TM is kept a multiple of 128 (>=128) so
    the MXU M dim is never starved; a short last tile is handled by cdiv grid."""
    if tm is not None:
        tm = min(int(tm), S)
        if tm >= S:
            return S
        if tm >= 128:
            return (tm // 128) * 128
        return max(8, (tm // 8) * 8)
    if S <= 512:
        return S  # whole (S, S) output tile trivially fits on every generation
    k_bytes = k_buffers * in_bytes * S * D
    avail = budget - k_bytes - (4 << 20)            # headroom for scratch/sems
    per_row = 2 * (in_bytes * D + out_bytes * S)    # dbl-buffered q tile + out tile
    tm_max = max(128, avail // per_row)
    tm_max = min(tm_max, 2048)
    if tm_max >= S:
        return S
    return max(128, (tm_max // 128) * 128)


# -------------------------------- wrapper -------------------------------------
def hmq_mul_qkt(q, k, scale, *, act_format=("bfp", 8, None), tm=None,
                use_bf16_inputs=False, out_dtype=jnp.float32):
    """q, k: [B, H, S, D]. Returns BFP-quantized (q @ k^T) * scale, [B, H, S, S].

    `use_bf16_inputs=True` is the fast path on v5e / v7x (single-pass bf16 MXU,
    halved input DMA / VMEM); it changes matmul numerics slightly vs f32.
    `out_dtype=jnp.bfloat16` is exact for power-of-two scales (mant_bits <= 8)
    and halves the dominant S*S output writeback if the consumer permits.
    """
    _, mant_bits, block_size = act_format
    B, H, S, D = q.shape
    assert k.shape == (B, H, S, D)
    if block_size is None:
        block_size = S  # one shared exponent per output row
    assert S % block_size == 0

    BH = B * H
    in_dtype = jnp.bfloat16 if use_bf16_inputs else q.dtype
    # Pre-cast in the wrapper (not per grid step in the kernel): halves q/k HBM
    # DMA + VMEM footprint and avoids re-casting the resident K every step.
    qf = q.reshape(BH, S, D).astype(in_dtype)
    kf = k.reshape(BH, S, D).astype(in_dtype)

    in_bytes = jnp.dtype(in_dtype).itemsize
    out_bytes = jnp.dtype(out_dtype).itemsize

    budget, _cap = _vmem_budget_bytes()

    # Resident K only changes at bh boundaries; single-buffer it when its double
    # buffer would eat too much of a small (v7x) VMEM budget.
    k_buffers = 2
    if 2 * in_bytes * S * D > budget // 4:
        k_buffers = 1

    tm = _choose_tm(tm, S, D, in_bytes, out_bytes, budget, k_buffers)
    grid_m = (S + tm - 1) // tm     # masked short last tile when tm ∤ S

    est = (2 * in_bytes * tm * D            # q tiles (double-buffered)
           + k_buffers * in_bytes * S * D   # resident K
           + 2 * out_bytes * tm * S         # output tiles (double-buffered)
           + (4 << 20))                     # headroom
    vmem_limit = int(min(budget, max(est, 32 << 20)))

    kernel = functools.partial(
        _qkt_bfp_kernel, mant_bits=int(mant_bits), block_size=int(block_size))

    scale_arr = jnp.asarray(scale, dtype=jnp.float32).reshape(1)

    k_spec_kwargs = {"pipeline_mode": pl.Buffered(1)} if k_buffers == 1 else {}

    out = pl.pallas_call(
        kernel,
        out_shape=jax.ShapeDtypeStruct((BH, S, S), out_dtype),
        grid_spec=pltpu.PrefetchScalarGridSpec(
            num_scalar_prefetch=0,
            grid=(BH, grid_m),
            in_specs=[
                # Runtime scale lives in SMEM (no recompile per scale value).
                pl.BlockSpec(memory_space=pltpu.MemorySpace.SMEM),
                # q tile: (TM, D), walks the query dim.
                pl.BlockSpec((pl.Squeezed(), tm, D), lambda bh, i: (bh, i, 0)),
                # k: whole (S, D), resident across the query-tile axis.
                pl.BlockSpec((pl.Squeezed(), S, D), lambda bh, i: (bh, 0, 0),
                             **k_spec_kwargs),
            ],
            # Output tile (TM, S): lane dim is the full key length (lane-dense
            # stores; BFP blocks never straddle a tile).
            out_specs=pl.BlockSpec((pl.Squeezed(), tm, S), lambda bh, i: (bh, i, 0)),
        ),
        compiler_params=pltpu.CompilerParams(
            dimension_semantics=("parallel", "parallel"),
            vmem_limit_bytes=vmem_limit,
        ),
    )(scale_arr, qf, kf)

    return out.reshape(B, H, S, S)


# ------------------------------ pure-JAX reference ----------------------------
def _reference(q, k, scale, mant_bits, block_size, cast_inputs_to=None):
    if cast_inputs_to is not None:
        q = q.astype(cast_inputs_to).astype(jnp.float32)
        k = k.astype(cast_inputs_to).astype(jnp.float32)
    s = jnp.einsum("bhsd,bhtd->bhst", q, k, precision=lax.Precision.HIGHEST)
    return _bfp_quantize(s, mant_bits, block_size, scale=float(scale))


def _check(name, out, ref, mant_bits, extra_rel=0.0):
    # Tolerance of ~2 BFP LSBs (of the largest block) plus an optional relative
    # margin: tiny matmul-order differences can flip one quantization step, so a
    # step-sized tolerance is the robust (non-flaky) correctness criterion.
    max_ref = float(jnp.max(jnp.abs(ref)))
    tol = 2.0 * max_ref * (2.0 ** -(mant_bits - 1)) + extra_rel * max_ref + 1e-6
    assert out.shape == ref.shape, f"{name}: shape mismatch"
    assert bool(jnp.all(jnp.isfinite(out))), f"{name}: non-finite output"
    assert bool(jnp.allclose(out, ref, atol=tol, rtol=0.0)), \
        f"{name}: mismatch vs reference (atol={tol})"


if __name__ == "__main__":
    key = jax.random.PRNGKey(0)
    k1, k2, k3, k4, k5, k6 = jax.random.split(key, 6)

    # --- Test A: small, single BFP block per row, non-power-of-two scale -------
    B, H, S, D = 2, 2, 8, 32
    qa = jax.random.normal(k1, (B, H, S, D), dtype=jnp.float32)
    ka = jax.random.normal(k2, (B, H, S, D), dtype=jnp.float32)
    out_a = jax.block_until_ready(
        hmq_mul_qkt(qa, ka, 0.7, act_format=("bfp", 8, S)))
    _check("A", out_a, _reference(qa, ka, 0.7, 8, S), 8)

    # --- Test B: tiled query dim, lane-dense multi-block BFP (nb > 1) ----------
    B, H, S, D = 1, 2, 256, 128
    qb = jax.random.normal(k3, (B, H, S, D), dtype=jnp.float32)
    kb = jax.random.normal(k4, (B, H, S, D), dtype=jnp.float32)
    out_b = jax.block_until_ready(
        hmq_mul_qkt(qb, kb, 0.125, act_format=("bfp", 8, 128), tm=128))
    _check("B", out_b, _reference(qb, kb, 0.125, 8, 128), 8)

    # --- Test C: non-dividing S -> cdiv grid with a masked short last tile -----
    B, H, S, D = 1, 1, 160, 128
    qc = jax.random.normal(k5, (B, H, S, D), dtype=jnp.float32)
    kc = jax.random.normal(k6, (B, H, S, D), dtype=jnp.float32)
    out_c = jax.block_until_ready(
        hmq_mul_qkt(qc, kc, 0.25, act_format=("bfp", 8, None), tm=128))
    _check("C", out_c, _reference(qc, kc, 0.25, 8, S), 8)

    # --- Test D: bf16-input fast path (recommended on v5e / v7x) ---------------
    out_d = jax.block_until_ready(
        hmq_mul_qkt(qb, kb, 0.125, act_format=("bfp", 8, None),
                    use_bf16_inputs=True))
    _check("D", out_d,
           _reference(qb, kb, 0.125, 8, 256, cast_inputs_to=jnp.bfloat16),
           8, extra_rel=0.01)

    print("KERNEL_OK")
</pallas_src>

<mosaic_0001>
module attributes {stable_mosaic.version = 11 : i64} {
  func.func @_qkt_bfp_kernel(%arg0: i32, %arg1: i32, %arg2: memref<1xf32, #tpu.memory_space<smem>>, %arg3: memref<1x8x32xf32, #tpu.memory_space<vmem>>, %arg4: memref<1x8x32xf32, #tpu.memory_space<vmem>>, %arg5: memref<1x8x8xf32, #tpu.memory_space<vmem>>) attributes {dimension_semantics = [#tpu.dimension_semantics<parallel>, #tpu.dimension_semantics<parallel>], iteration_bounds = array<i64: 4, 1>, scalar_prefetch = 0 : i64, scratch_operands = 0 : i64, tpu.core_type = #tpu.core_type<tc>, window_params = [{transform_indices = @transform_0, window_bounds = array<i64: 1>}, {transform_indices = @transform_1, window_bounds = array<i64: 1, 8, 32>}, {transform_indices = @transform_2, window_bounds = array<i64: 1, 8, 32>}, {transform_indices = @transform_3, window_bounds = array<i64: 1, 8, 8>}]} {
    %c0 = arith.constant 0 : index
    %c0_0 = arith.constant 0 : index
    %c0_1 = arith.constant 0 : index
    %0 = vector.load %arg3[%c0, %c0_0, %c0_1] : memref<1x8x32xf32, #tpu.memory_space<vmem>>, vector<1x8x32xf32>
    %1 = vector.shape_cast %0 : vector<1x8x32xf32> to vector<8x32xf32>
    %c0_2 = arith.constant 0 : index
    %c0_3 = arith.constant 0 : index
    %c0_4 = arith.constant 0 : index
    %2 = vector.load %arg4[%c0_2, %c0_3, %c0_4] : memref<1x8x32xf32, #tpu.memory_space<vmem>>, vector<1x8x32xf32>
    %3 = vector.shape_cast %2 : vector<1x8x32xf32> to vector<8x32xf32>
    %cst = arith.constant dense<0.000000e+00> : vector<8x8xf32>
    %4 = tpu.matmul %1, %3, %cst {dimension_numbers = #tpu.dot_dimension_numbers<[1], [1], [0], [0], [0, 0, 1, 0], [], []>} : vector<8x32xf32>, vector<8x32xf32>, vector<8x8xf32> -> vector<8x8xf32>
    %c0_5 = arith.constant 0 : index
    %5 = memref.load %arg2[%c0_5] : memref<1xf32, #tpu.memory_space<smem>>
    %cst_6 = arith.constant dense<0xFF800000> : vector<8xf32>
    %6 = vector.multi_reduction <maximumf>, %4, %cst_6 [1] : vector<8x8xf32> to vector<8xf32>
    %7 = vector.shape_cast %6 : vector<8xf32> to vector<8x1xf32>
    %cst_7 = arith.constant dense<0x7F800000> : vector<8xf32>
    %8 = vector.multi_reduction <minimumf>, %4, %cst_7 [1] : vector<8x8xf32> to vector<8xf32>
    %9 = vector.shape_cast %8 : vector<8xf32> to vector<8x1xf32>
    %cst_8 = arith.constant 0.000000e+00 : f32
    %10 = vector.broadcast %cst_8 : f32 to vector<8x1xf32>
    %11 = arith.subf %10, %9 : vector<8x1xf32>
    %12 = arith.maximumf %7, %11 : vector<8x1xf32>
    %13 = tpu.bitcast %12 : vector<8x1xf32> -> vector<8x1xi32>
    %c23_i32 = arith.constant 23 : i32
    %14 = vector.broadcast %c23_i32 : i32 to vector<8x1xi32>
    %15 = arith.shrsi %13, %14 : vector<8x1xi32>
    %c255_i32 = arith.constant 255 : i32
    %16 = vector.broadcast %c255_i32 : i32 to vector<8x1xi32>
    %17 = arith.andi %15, %16 : vector<8x1xi32>
    %c7_i32 = arith.constant 7 : i32
    %18 = vector.broadcast %c7_i32 : i32 to vector<8x1xi32>
    %19 = arith.subi %17, %18 : vector<8x1xi32>
    %c1_i32 = arith.constant 1 : i32
    %c254_i32 = arith.constant 254 : i32
    %20 = vector.broadcast %c1_i32 : i32 to vector<8x1xi32>
    %21 = arith.maxsi %20, %19 : vector<8x1xi32>
    %22 = vector.broadcast %c254_i32 : i32 to vector<8x1xi32>
    %23 = arith.minsi %22, %21 : vector<8x1xi32>
    %c254_i32_9 = arith.constant 254 : i32
    %24 = vector.broadcast %c254_i32_9 : i32 to vector<8x1xi32>
    %25 = arith.subi %24, %23 : vector<8x1xi32>
    %c1_i32_10 = arith.constant 1 : i32
    %c254_i32_11 = arith.constant 254 : i32
    %26 = vector.broadcast %c1_i32_10 : i32 to vector<8x1xi32>
    %27 = arith.maxsi %26, %25 : vector<8x1xi32>
    %28 = vector.broadcast %c254_i32_11 : i32 to vector<8x1xi32>
    %29 = arith.minsi %28, %27 : vector<8x1xi32>
    %c23_i32_12 = arith.constant 23 : i32
    %30 = vector.broadcast %c23_i32_12 : i32 to vector<8x1xi32>
    %31 = arith.shli %23, %30 : vector<8x1xi32>
    %32 = tpu.bitcast %31 : vector<8x1xi32> -> vector<8x1xf32>
    %c23_i32_13 = arith.constant 23 : i32
    %33 = vector.broadcast %c23_i32_13 : i32 to vector<8x1xi32>
    %34 = arith.shli %29, %33 : vector<8x1xi32>
    %35 = tpu.bitcast %34 : vector<8x1xi32> -> vector<8x1xf32>
    %36 = vector.broadcast %35 : vector<8x1xf32> to vector<8x8xf32>
    %37 = arith.mulf %4, %36 : vector<8x8xf32>
    %38 = math.roundeven %37 : vector<8x8xf32>
    %cst_14 = arith.constant -1.280000e+02 : f32
    %cst_15 = arith.constant 1.270000e+02 : f32
    %39 = vector.broadcast %cst_14 : f32 to vector<8x8xf32>
    %40 = arith.maximumf %39, %38 : vector<8x8xf32>
    %41 = vector.broadcast %cst_15 : f32 to vector<8x8xf32>
    %42 = arith.minimumf %41, %40 : vector<8x8xf32>
    %43 = vector.broadcast %5 : f32 to vector<8x1xf32>
    %44 = arith.mulf %32, %43 : vector<8x1xf32>
    %45 = vector.broadcast %44 : vector<8x1xf32> to vector<8x8xf32>
    %46 = arith.mulf %42, %45 : vector<8x8xf32>
    %c0_16 = arith.constant 0 : index
    %c0_17 = arith.constant 0 : index
    %c0_18 = arith.constant 0 : index
    %47 = vector.load %arg5[%c0_16, %c0_17, %c0_18] : memref<1x8x8xf32, #tpu.memory_space<vmem>>, vector<1x8x8xf32>
    %48 = vector.shape_cast %47 : vector<1x8x8xf32> to vector<8x8xf32>
    %49 = vector.shape_cast %46 : vector<8x8xf32> to vector<1x8x8xf32>
    tpu.vector_store %arg5[%c0_16, %c0_17, %c0_18], %49 {strides = array<i32>} : memref<1x8x8xf32, #tpu.memory_space<vmem>>, vector<1x8x8xf32>,
    return
  }
  func.func @transform_0(%arg0: i32, %arg1: i32) -> i32 {
    %c0_i32 = arith.constant 0 : i32
    %c0_i32_0 = arith.constant 0 : i32
    return %c0_i32 : i32
  }
  func.func @transform_1(%arg0: i32, %arg1: i32) -> (i32, i32, i32) {
    %c0_i32 = arith.constant 0 : i32
    %c0_i32_0 = arith.constant 0 : i32
    return %arg0, %arg1, %c0_i32 : i32, i32, i32
  }
  func.func @transform_2(%arg0: i32, %arg1: i32) -> (i32, i32, i32) {
    %c0_i32 = arith.constant 0 : i32
    %c0_i32_0 = arith.constant 0 : i32
    %c0_i32_1 = arith.constant 0 : i32
    return %arg0, %c0_i32, %c0_i32_0 : i32, i32, i32
  }
  func.func @transform_3(%arg0: i32, %arg1: i32) -> (i32, i32, i32) {
    %c0_i32 = arith.constant 0 : i32
    %c0_i32_0 = arith.constant 0 : i32
    return %arg0, %arg1, %c0_i32 : i32, i32, i32
  }
}

</mosaic_0001>

<bundles_post_ra>
// kernel: tpu_custom_call.1
= control target key start
LH: loop header
LB: loop body
LE: loop exit
PB: predicated region body
PF: predicated region fallthrough
CT: control target
= control target key end

     0   :  { %s828_s0 = inlined_call_operand.<no memory space> [shape: f32[1], index: 0, kind: input, shape index: {}]   ;;  %s829_s1 = inlined_call_operand.hbm [shape: f32[4,8,32], index: 1, kind: input, shape index: {}]   ;;  %s830_s2 = inlined_call_operand.hbm [shape: f32[4,8,32], index: 2, kind: input, shape index: {}]   ;;  %s831_s3 = inlined_call_operand.hbm [shape: f32[4,8,8], index: 3, kind: output, shape index: {}]  }
   0x1   :  { %8 = sst [smem:[#allocation2]] %s828_s0 }
   0x2   :  { %9 = vsyncpa [#allocation4], 0 }
   0x3   :  { %11 = vsyncpa [#allocation4 + $0x1], 0 }
   0x4   :  { %12 = vsyncpa [#allocation7], 0 }
   0x5   :  { %14 = vsyncpa [#allocation7 + $0x1], 0 }
   0x6   :  { %15 = vsyncpa [#allocation5], 0 }
   0x7   :  { %17 = vsyncpa [#allocation5 + $0x1], 0  ;;  %s694_s14 = smov 0   ;;  %s696_s15 = smov 0  }
   0x8   :  { %s698_s16 = smov 0   ;;  %s700_s17 = smov 0  }
   0x9   :  { %s702_s18 = smov 0   ;;  %s704_s19 = smov 0  }
   0xa LB: > { %s429_s0 = sadd.s32 4294967295, %s669_s19   ;;  %s430_s20 = sadd.s32 4294967294, %s669_s19   ;;  %s669_s19 = sphi %s704_s19, %s23_s19   ;;  %s665_s18 = sphi %s702_s18, %s840_s18   ;;  %s661_s17 = sphi %s700_s17, %s839_s17   ;;  %s657_s16 = sphi %s698_s16, %s838_s16   ;;  %s653_s15 = sphi %s696_s15, %s837_s15   ;;  %s649_s14 = sphi %s694_s14, %s836_s14  }
   0xb   : > { %s35_s21 = sadd.s32 1, %s665_s18  ;;  %s65_s22 = sadd.s32 1, %s657_s16 }
   0xc   : > { %p37_p0 = scmp.ge.s32.totalorder %s35_s21, 4  ;;  %p72_p1 = scmp.ne.s32.totalorder %s657_s16, %s653_s15 }
   0xd   : > { %p73_p2 = scmp.eq.s32.totalorder %s669_s19, 0  ;;  %p78_p3 = scmp.ne.s32.totalorder %s653_s15, %s649_s14 }
   0xe   : > { %s842_s21 = smov (%p37_p0, %s35_s21), 0  ;;  %p79_p5 = scmp.eq.s32.totalorder %s429_s0, 0 }
   0xf   : > { %p735_p4 = por %p73_p2, %p72_p1  ;;  %s60_s24 = ssub.s32 %s665_s18, %s842_s21 }
  0x10   : > { %p130_p6 = scmp.eq.s32.totalorder %s429_s0, 3  ;;  %p63_p7 = scmp.eq.s32.totalorder %s60_s24, 0 }
  0x11   : > { %p741_p8 = por %p79_p5, %p78_p3  ;;  %p136_p10 = scmp.eq.s32.totalorder %s430_s20, 3 }
  0x12   : > { %p745_p9 = por %p130_p6, %p72_p1  ;;  %p473_p12 = scmp.lt.s32.totalorder %s669_s19, 4 }
  0x13   : > { %s750_s27 = scalar_select %p63_p7, %s657_s16, %s65_s22  }
  0x14   : > { %p752_p11 = por %p136_p10, %p78_p3  ;;  %s159_s29 = sand.u32 1, %s657_s16  }
  0x15   : > { %s433_s30 = sshll.u32 %s159_s29, 3  ;;  %s434_s4 = sshll.u32 %s665_s18, 3 }
  0x16   : > { %s168_s7 = scalar_lea.hbm %s829_s1, %s434_s4  ;;  %s163_s8 = scalar_lea.vmem [#allocation3], %s433_s30 }
  0x17   : > { %s172_s9 = sshll.u32 %s163_s8, 4  ;;  %s170_s10 = sshll.u32 %s168_s7, 4  ;;  %s173_s9 = int_to_ptr.vmem [resolvable:$true] %s172_s9  ;;  %s171_s10 = int_to_ptr.hbm [resolvable:$true] %s170_s10 }
  0x18   : > { %p463_p13 = pnand %p473_p12, %p735_p4  ;;  %p437_p0 = scmp.ge.s32.totalorder %s669_s19, 1 }
  0x19   : > { %p196_p1 = scmp.lt.s32.totalorder %s669_s19, 5  ;;  %s160_s11 = scalar_lea.sflag [#allocation4], %s159_s29 }
  0x1a   : > { %465 = dma.hbm_to_vmem [thread:$0]  (!%p463_p13), %s171_s10, 128, %s173_s9, %s160_s11  }
  0x1b   : > { %p197_p2 = pnand %p437_p0, %p196_p1  ;;  %s187_s0 = scalar_lea.hbm %s830_s2, %s434_s4 }
  0x1c   : > { %s183_s20 = scalar_lea.vmem [#allocation6], %s433_s30  ;;  %s189_s24 = sshll.u32 %s187_s0, 4  ;;  %s190_s24 = int_to_ptr.hbm [resolvable:$true] %s189_s24 }
  0x1d   : > { %s191_s22 = sshll.u32 %s183_s20, 4  ;;  %s180_s5 = scalar_lea.sflag [#allocation7], %s159_s29  ;;  %s192_s22 = int_to_ptr.vmem [resolvable:$true] %s191_s22 }
  0x1e   : > { %468 = dma.hbm_to_vmem [thread:$0]  (!%p463_p13), %s190_s24, 128, %s192_s22, %s180_s5  }
  0x1f   : > { %200 = sbr.rel (%p197_p2) target bundleno = 334 (0x14e), region = 32  ;;  %s770_s23 = sand.u32 (!%p197_p2), 1, %s653_s15  }
  0x20   : > { %s773_s6 = sshll.u32 (!%p197_p2), %s770_s23, 3  ;;  %s203_s7 = scalar_lea.sflag (!%p197_p2), [#allocation4], %s770_s23 }
  0x21   : > { %s206_s8 = scalar_lea.vmem (!%p197_p2), [#allocation3], %s773_s6 }
  0x24   : > { %636 = dma.done.wait (%p741_p8), %s203_s7, 128  }
  0x25   : > { %638 = vsyncadd (%p741_p8), %s203_s7, 4294967168  ;;  %s213_s29 = scalar_lea.sflag [#allocation7], %s770_s23  ;;  %s216_s30 = scalar_lea.vmem [#allocation6], %s773_s6 }
  0x26   : > { %640 = dma.done.wait (%p741_p8), %s213_s29, 128  }
  0x27   : > { %642 = vsyncadd (%p741_p8), %s213_s29, 4294967168  ;;  %vm247_vm0 = vcmask 261120   ;;  %v246_v0 = vld [vmem:[%s216_s30] sm:$0xff]  ;;  %v245_v1 = vld [vmem:[%s206_s8] sm:$0xff]  ;;  %vm275_vm1 = vcmask 64512   ;;  %s274_s25 = sld [smem:[#allocation2]] }
  0x28   : > { %441 = vmatpush.xpose.msk.msra.mxu0 %vm247_vm0, %v246_v0  ;;  %s445_s4 = sshll.u32 %s661_s17, 3  ;;  %s244_s12 = scalar_lea.vmem [#allocation8], %s773_s6 }
  0x29   : > { %s321_s11 = scalar_lea.hbm %s831_s3, %s445_s4  ;;  %s323_s13 = sshll.u32 %s244_s12, 4  ;;  %s324_s13 = int_to_ptr.vmem [resolvable:$true] %s323_s13 }
  0x2a   : > { %s325_s0 = sshll.u32 %s321_s11, 4  ;;  %s310_s17 = scalar_lea.sflag [#allocation5], %s770_s23  ;;  %s326_s0 = int_to_ptr.hbm [resolvable:$true] %s325_s0 }
  0x2b   : > { %442 = vmatmul.msk.f32.vlgmr.msra.gmra.mxu0 %vm247_vm0, %v245_v1  ;;  %s597_s20 = sshra.s32 %s326_s0, 4  ;;  %s603_s6 = scalar_lea.hbm %s831_s3, 32  ;;  %s598_s20 = int_to_ptr.hbm [resolvable:$true] %s597_s20 }
  0x2c   : > { %s599_s22 = scalar_lea.hbm %s598_s20, 8  ;;  %p604_p6 = scmp.lt.s32.totalorder %s598_s20, %s831_s3 }
  0x2d   : > { %v305_v26 = vstv %s274_s25  ;;  %p600_p3 = scmp.ne.s32.totalorder %s598_s20, %s599_s22  ;;  %p605_p7 = scmp.lt.s32.totalorder %s603_s6, %s599_s22 }
  0x2f   : > { %p601_p4 = pnand %p600_p3, %p745_p9  ;;  %p606_p8 = por %p605_p7, %p604_p6 }
  0x31   : > { %p602_p5 = pneg %p601_p4 }
  0x33   : > { %p607_p10 = pnand %p606_p8, %p602_p5 }
  0xa8   : > { %v271_v2 = vpop.f32.mrf.mxu0 }
  0xa9   : > { %v279_v3 = vsel %vm275_vm1, %v271_v2, inf  ;;  %v276_v4 = vsel %vm275_vm1, %v271_v2, -inf }
  0xaa   : > { %280 = vmin.xlane.f32.xlu0 %v279_v3 }
  0xb2   : > { %277 = vmax.xlane.f32.xlu0 %v276_v4 }
 0x11d   : > { %v281_v5 = vpop.xlane.xlu0 %280 }
 0x11e   : > { %v282_v6 = vsub.f32 0.0, %v281_v5 }
 0x125   : > { %v278_v7 = vpop.xlane.xlu0 %277 }
 0x126   : > { %v283_v8 = vmax.f32 %v278_v7, %v282_v6 }
 0x128   : > { %v285_v9 = vshra.s32 %v283_v8, 23 }
 0x12a   : > { %v286_v10 = vand.u32 255, %v285_v9 }
 0x12c   : > { %v443_v11 = vadd.s32 4294967289, %v286_v10 }
 0x12e   : > { %vm288_vm2 = vcmp.gt.s32.totalorder %v443_v11, 1 }
 0x12f   : > { %v289_v12 = vsel %vm288_vm2, %v443_v11, 1 }
 0x130   : > { %vm290_vm3 = vcmp.lt.s32.totalorder %v289_v12, 254 }
 0x131   : > { %v291_v13 = vsel %vm290_vm3, %v289_v12, 254 }
 0x132   : > { %v292_v14 = vsub.s32 254, %v291_v13  ;;  %v297_v25 = vshll.u32 %v291_v13, 23 }
 0x134   : > { %vm293_vm4 = vcmp.gt.s32.totalorder %v292_v14, 1  ;;  %v306_v30 = vmul.f32 %v305_v26, %v297_v25 }
 0x135   : > { %v294_v15 = vsel %vm293_vm4, %v292_v14, 1 }
 0x136   : > { %vm295_vm5 = vcmp.lt.s32.totalorder %v294_v15, 254 }
 0x137   : > { %v296_v16 = vsel %vm295_vm5, %v294_v15, 254 }
 0x138   : > { %v299_v17 = vshll.u32 %v296_v16, 23 }
 0x13a   : > { %v301_v18 = vmul.f32 %v299_v17, %v271_v2 }
 0x13c   : > { %v450_v19 = vcvt.f32.s32 %v301_v18  ;;  %v448_v21 = vand.u32 2147483647, %v301_v18  ;;  %v453_v23 = vand.u32 2147483648, %v301_v18 }
 0x13e   : > { %v451_v20 = vcvt.s32.f32 %v450_v19  ;;  %vm449_vm6 = vcmp.lt.f32.partialorder %v448_v21, 8388608.0 }
 0x140   : > { %v452_v22 = vand.u32 2147483647, %v451_v20 }
 0x142   : > { %v454_v24 = vor.u32 %v453_v23, %v452_v22 }
 0x144   : > { %v455_v27 = vsel %vm449_vm6, %v454_v24, %v301_v18 }
 0x145   : > { %v303_v28 = vmax.f32 %v455_v27, -128.0 }
 0x147   : > { %v304_v29 = vmin.f32 %v303_v28, 127.0 }
 0x149   : > { %v307_v31 = vmul.f32 %v306_v30, %v304_v29 }
 0x14b   : > { %308 = vst.msk [vmem:[%s244_s12] sm:$0xff] %vm275_vm1, %v307_v31 }
 0x14c   : > { %610 = shalt.err (!%p607_p10)
}
 0x14d   : > { %460 = dma.vmem_to_hbm [thread:$0]  (%p745_p9), %s324_s13, 128, %s326_s0, %s310_s17  }
 0x14e PF: > { %p474_p12 = scmp.ge.s32.totalorder %s669_s19, 2  ;;  %s337_s23 = sand.u32 1, %s649_s14  }
 0x14f   : > { %s338_s29 = scalar_lea.sflag [#allocation5], %s337_s23 }
 0x150   : > { %p470_p13 = pnand %p474_p12, %p752_p11 }
 0x152   : > { %p471_p0 = pneg %p470_p13 }
 0x154   : > { %644 = dma.done.wait (%p471_p0), %s338_s29, 128  }
 0x155   : > { %646 = vsyncadd (%p471_p0), %s338_s29, 4294967168  ;;  %s23_s19 = sadd.s32 1, %s669_s19   ;;  %s836_s14 = smov %s653_s15 }
 0x156   : > { %p20_p1 = scmp.ge.s32.totalorder %s23_s19, 6   ;;  %s837_s15 = smov %s657_s16 }
 0x157   : > { %s838_s16 = smov %s750_s27  ;;  %s839_s17 = smov %s665_s18 }
 0x158   : > { %s840_s18 = smov %s842_s21  ;;  %22 = sbr.rel (!%p20_p1) target bundleno = 10 (0xa), region = 90 }
 0x15d   :  { %344 = vsyncpa [#allocation4], 1 }
 0x15e   :  { %346 = vsyncpa [#allocation4 + $0x1], 1 }
 0x15f   :  { %347 = vsyncpa [#allocation7], 1 }
 0x160   :  { %349 = vsyncpa [#allocation7 + $0x1], 1 }
 0x161   :  { %350 = vsyncpa [#allocation5], 1 }
 0x162   :  { %352 = vsyncpa [#allocation5 + $0x1], 1 }

</bundles_post_ra>
